<compile_context>
chip_gen: v6e
topology: v6e:2x2x1
jax: 0.10.0
libtpu: 0.0.40
codegen_flags: <defaults>
</compile_context>

<pallas_src>
import jax
import jax.numpy as jnp
from jax.experimental import pallas as pl
from jax.experimental.pallas import tpu as pltpu

_LANE = 512        # lane-dense last dim, multiple of 128
_TM_MAX = 512      # max sublane rows per block -> 512*512*4B = 1 MiB f32 block
_MIN_PALLAS_ELEMS = 4096  # below this, a standalone kernel launch cannot win


def _affine_kernel(w_ref, b_ref, x_ref, o_ref):
    # w_ref, b_ref: (1, 1) scalars in SMEM; x_ref/o_ref: (TM, _LANE) VMEM tiles.
    # Single fused VPU multiply-add; deliberately no MXU involvement — this
    # kernel is HBM-bandwidth-bound.
    o_ref[...] = x_ref[...] * w_ref[0, 0] + b_ref[0, 0]


def s0_forward(x, weight, bias, *, force_pallas=False):
    """y = x * weight + bias (nn.Linear(1, 1)) with a lane-dense Pallas kernel.

    x: (..., 1) float32. weight, bias: scalar float32 parameters.
    """
    orig_shape = x.shape
    assert orig_shape[-1] == 1, "Linear(1,1) expects trailing dim 1"
    x = x.astype(jnp.float32)
    w = jnp.asarray(weight, jnp.float32)
    b = jnp.asarray(bias, jnp.float32)

    xf = x.reshape(-1)
    m = xf.shape[0]

    # Tiny inputs: launch overhead dominates; just let XLA fuse the FMA.
    if m < _MIN_PALLAS_ELEMS and not force_pallas:
        return (x * w + b).reshape(orig_shape)

    # ---- lane-dense layout plumbing (pure reshape/pad, no compute) ----
    rows = pl.cdiv(m, _LANE)                    # rows of width _LANE needed
    rows8 = max(8, ((rows + 7) // 8) * 8)       # sublane multiple of 8
    tm = min(_TM_MAX, rows8)                    # block sublane rows (mult of 8)
    rows_padded = pl.cdiv(rows8, tm) * tm       # whole number of blocks
    total = rows_padded * _LANE
    if total != m:
        xf = jnp.pad(xf, (0, total - m))        # zero-pad tail
    x2d = xf.reshape(rows_padded, _LANE)

    w_arr = w.reshape(1, 1)
    b_arr = b.reshape(1, 1)

    out2d = pl.pallas_call(
        _affine_kernel,
        out_shape=jax.ShapeDtypeStruct((rows_padded, _LANE), jnp.float32),
        grid_spec=pl.GridSpec(
            grid=(rows_padded // tm,),
            in_specs=[
                pl.BlockSpec(memory_space=pltpu.MemorySpace.SMEM),  # weight
                pl.BlockSpec(memory_space=pltpu.MemorySpace.SMEM),  # bias
                pl.BlockSpec((tm, _LANE), lambda i: (i, 0)),        # x tile
            ],
            out_specs=pl.BlockSpec((tm, _LANE), lambda i: (i, 0)),
        ),
        compiler_params=pltpu.CompilerParams(
            dimension_semantics=("parallel",),
        ),
    )(w_arr, b_arr, x2d)

    # Slice off the padded tail before restoring the original (..., 1) shape.
    return out2d.reshape(-1)[:m].reshape(orig_shape)


if __name__ == "__main__":
    key = jax.random.PRNGKey(0)
    kx, kb, kx2 = jax.random.split(key, 3)

    # Deterministic parameter init matching the module's __init__:
    #   weight = s_init = 0.0 (constant init)
    #   bias   ~ U(-1, 1)  (PyTorch default Linear bias init with fan_in=1)
    s_init = 0.0
    weight = jnp.float32(s_init)
    bias = jax.random.uniform(kb, (), jnp.float32, minval=-1.0, maxval=1.0)

    # Small demo input consistent with Linear(1, 1): batch=2, seq=8, feat=1.
    x_small = jax.random.normal(kx, (2, 8, 1), jnp.float32)

    # 1) Tiny input, Pallas path forced (exercises the kernel itself).
    y_small = jax.block_until_ready(s0_forward(x_small, weight, bias,
                                               force_pallas=True))
    ref_small = x_small * weight + bias
    assert y_small.shape == x_small.shape
    assert jnp.allclose(y_small, ref_small, atol=1e-6), "mismatch (small/pallas)"

    # 2) Tiny input, auto dispatch (plain-JAX fast path) — same numerics.
    y_fast = jax.block_until_ready(s0_forward(x_small, weight, bias))
    assert jnp.allclose(y_fast, ref_small, atol=1e-6), "mismatch (fast path)"

    # 3) Larger input (non-multiple of lane width) exercising the tiled,
    #    multi-block pipelined grid and the padded-tail slicing.
    x_big = jax.random.normal(kx2, (4, 131072 + 37, 1), jnp.float32)
    y_big = jax.block_until_ready(s0_forward(x_big, weight, bias))
    ref_big = x_big * weight + bias
    assert y_big.shape == x_big.shape
    assert jnp.allclose(y_big, ref_big, atol=1e-6), "mismatch (large/tiled)"

    print("KERNEL_OK")
</pallas_src>

<mosaic_0001>
module attributes {stable_mosaic.version = 11 : i64} {
  func.func @_affine_kernel(%arg0: i32, %arg1: memref<1x1xf32, #tpu.memory_space<smem>>, %arg2: memref<1x1xf32, #tpu.memory_space<smem>>, %arg3: memref<8x512xf32, #tpu.memory_space<vmem>>, %arg4: memref<8x512xf32, #tpu.memory_space<vmem>>) attributes {dimension_semantics = [#tpu.dimension_semantics<parallel>], iteration_bounds = array<i64: 1>, scalar_prefetch = 0 : i64, scratch_operands = 0 : i64, tpu.core_type = #tpu.core_type<tc>, window_params = [{transform_indices = @transform_0, window_bounds = array<i64: 1, 1>}, {transform_indices = @transform_1, window_bounds = array<i64: 1, 1>}, {transform_indices = @transform_2, window_bounds = array<i64: 8, 512>}, {transform_indices = @transform_3, window_bounds = array<i64: 8, 512>}]} {
    %c0 = arith.constant 0 : index
    %c0_0 = arith.constant 0 : index
    %0 = vector.load %arg3[%c0, %c0_0] : memref<8x512xf32, #tpu.memory_space<vmem>>, vector<8x512xf32>
    %c0_1 = arith.constant 0 : index
    %c0_2 = arith.constant 0 : index
    %1 = memref.load %arg1[%c0_1, %c0_2] : memref<1x1xf32, #tpu.memory_space<smem>>
    %2 = vector.broadcast %1 : f32 to vector<8x512xf32>
    %3 = arith.mulf %0, %2 : vector<8x512xf32>
    %c0_3 = arith.constant 0 : index
    %c0_4 = arith.constant 0 : index
    %4 = memref.load %arg2[%c0_3, %c0_4] : memref<1x1xf32, #tpu.memory_space<smem>>
    %5 = vector.broadcast %4 : f32 to vector<8x512xf32>
    %6 = arith.addf %3, %5 : vector<8x512xf32>
    %c0_5 = arith.constant 0 : index
    %c0_6 = arith.constant 0 : index
    %7 = vector.load %arg4[%c0_5, %c0_6] : memref<8x512xf32, #tpu.memory_space<vmem>>, vector<8x512xf32>
    tpu.vector_store %arg4[%c0_5, %c0_6], %6 {strides = array<i32>} : memref<8x512xf32, #tpu.memory_space<vmem>>, vector<8x512xf32>,
    return
  }
  func.func @transform_0(%arg0: i32) -> (i32, i32) {
    %c0_i32 = arith.constant 0 : i32
    %c0_i32_0 = arith.constant 0 : i32
    %c0_i32_1 = arith.constant 0 : i32
    return %c0_i32, %c0_i32_0 : i32, i32
  }
  func.func @transform_1(%arg0: i32) -> (i32, i32) {
    %c0_i32 = arith.constant 0 : i32
    %c0_i32_0 = arith.constant 0 : i32
    %c0_i32_1 = arith.constant 0 : i32
    return %c0_i32, %c0_i32_0 : i32, i32
  }
  func.func @transform_2(%arg0: i32) -> (i32, i32) {
    %c0_i32 = arith.constant 0 : i32
    %c0_i32_0 = arith.constant 0 : i32
    return %arg0, %c0_i32 : i32, i32
  }
  func.func @transform_3(%arg0: i32) -> (i32, i32) {
    %c0_i32 = arith.constant 0 : i32
    %c0_i32_0 = arith.constant 0 : i32
    return %arg0, %c0_i32 : i32, i32
  }
}

</mosaic_0001>

<bundles_post_ra>
// kernel: tpu_custom_call.1
= control target key start
LH: loop header
LB: loop body
LE: loop exit
PB: predicated region body
PF: predicated region fallthrough
CT: control target
= control target key end

     0   :  { %10 = vsyncpa [#allocation5], 0  ;;  %s144_s0 = inlined_call_operand.<no memory space> [shape: f32[1,1], index: 0, kind: input, shape index: {}]   ;;  %s145_s1 = inlined_call_operand.<no memory space> [shape: f32[1,1], index: 1, kind: input, shape index: {}]   ;;  %s146_s2 = inlined_call_operand.hbm [shape: f32[8,512], index: 2, kind: input, shape index: {}]   ;;  %s147_s3 = inlined_call_operand.hbm [shape: f32[8,512], index: 3, kind: output, shape index: {}]  }
   0x1   :  { %11 = vsyncpa [#allocation6], 0  ;;  %s110_s12 = smov [#allocation4]  }
   0x2   :  { %s22_s13 = sshll.u32 %s110_s12, 4  ;;  %s23_s13 = int_to_ptr.vmem [resolvable:$true] %s22_s13 }
   0x3   :  { %s74_s14 = scalar_lea.vmem %s23_s13, 512  ;;  %p79_p1 = scmp.lt.s32.totalorder %s23_s13, %s23_s13 }
   0x4   :  { %p75_p0 = scmp.ne.s32.totalorder %s23_s13, %s74_s14  ;;  %p80_p2 = scmp.lt.s32.totalorder %s74_s14, %s74_s14 }
   0x6   :  { %p81_p3 = por %p80_p2, %p79_p1 }
   0x8   :  { %p82_p4 = pnand %p81_p3, %p75_p0 }
   0xa   :  { %85 = shalt.err (!%p82_p4)
}
   0xb   :  { %25 = dma.hbm_to_vmem [thread:$0]  %s146_s2, 512, %s23_s13, [#allocation5]  }
   0xc   :  { %106 = dma.done.wait [#allocation5], 512  }
   0xd   :  { %107 = vsyncadd [#allocation5], 4294966784  ;;  %v34_v0 = vstv %s144_s0  ;;  %v29_v1 = vld [vmem:[#allocation4] sm:$0xff]  ;;  %v40_v2 = vstv %s145_s1  ;;  %v30_v3 = vld [vmem:[#allocation4 + $0x8] sm:$0xff]  ;;  %s111_s21 = smov [#allocation7]  }
   0xe   :  { %v31_v4 = vld [vmem:[#allocation4 + $0x10] sm:$0xff]  ;;  %v35_v5 = vmul.f32 %v34_v0, %v29_v1  ;;  %v36_v6 = vmul.f32 %v34_v0, %v30_v3  ;;  %v32_v8 = vld [vmem:[#allocation4 + $0x18] sm:$0xff]  ;;  %s55_s22 = sshll.u32 %s111_s21, 4  ;;  %s56_s22 = int_to_ptr.vmem [resolvable:$true] %s55_s22 }
   0xf   :  { %v37_v7 = vmul.f32 %v34_v0, %v31_v4  ;;  %v38_v9 = vmul.f32 %v34_v0, %v32_v8  ;;  %s86_s0 = scalar_lea.vmem %s56_s22, 512  ;;  %p91_p6 = scmp.lt.s32.totalorder %s56_s22, %s56_s22 }
  0x10   :  { %v41_v10 = vadd.f32 %v40_v2, %v35_v5  ;;  %v42_v11 = vadd.f32 %v40_v2, %v36_v6  ;;  %p87_p5 = scmp.ne.s32.totalorder %s56_s22, %s86_s0  ;;  %p92_p7 = scmp.lt.s32.totalorder %s86_s0, %s86_s0 }
  0x11   :  { %v43_v12 = vadd.f32 %v40_v2, %v37_v7  ;;  %v44_v13 = vadd.f32 %v40_v2, %v38_v9 }
  0x12   :  { %45 = vst [vmem:[#allocation7] sm:$0xff] %v41_v10  ;;  %46 = vst [vmem:[#allocation7 + $0x8] sm:$0xff] %v42_v11  ;;  %p93_p8 = por %p92_p7, %p91_p6 }
  0x13   :  { %47 = vst [vmem:[#allocation7 + $0x10] sm:$0xff] %v43_v12  ;;  %48 = vst [vmem:[#allocation7 + $0x18] sm:$0xff] %v44_v13 }
  0x14   :  { %p94_p9 = pnand %p93_p8, %p87_p5 }
  0x16   :  { %97 = shalt.err (!%p94_p9)
}
  0x17   :  { %58 = dma.vmem_to_hbm [thread:$0]  %s56_s22, 512, %s147_s3, [#allocation6]  }
  0x18   :  { %108 = dma.done.wait [#allocation6], 512  }
  0x19   :  { %109 = vsyncadd [#allocation6], 4294966784 }
  0x1a   :  { %62 = vsyncpa [#allocation5], 1 }
  0x1b   :  { %63 = vsyncpa [#allocation6], 1 }

</bundles_post_ra>
